<compile_context>
chip_gen: v5e
topology: v5e:2x2
jax: 0.10.0
libtpu: 0.0.40
codegen_flags: <defaults>
</compile_context>

<pallas_src>
import jax
import jax.numpy as jnp
from jax.experimental import pallas as pl
from jax.experimental.pallas import tpu as pltpu


def _round_up(x, m):
    return ((x + m - 1) // m) * m


# ------------------------------------------------------------------------
# Pallas kernel: fused collision-probability + fc(+relu) + fc2(+relu)
# ------------------------------------------------------------------------
def encoder_kernel(x1_ref, relxy_ref, aux2_ref,
                   w1a_ref, w1c_ref, w2h_ref, w2aux_ref, out_ref):
    # Collision probability (f32 elementwise, EUP for sqrt/sigmoid):
    #   col = where(d != 0, 1 - sigmoid((d - 0.55)*10), 0)  with d = sqrt(x^2+y^2)
    relx = relxy_ref[0]                               # (TB, A)
    rely = relxy_ref[1]                               # (TB, A)
    d2 = relx * relx + rely * rely
    col = jnp.where(d2 != 0.0,
                    jax.nn.sigmoid(-10.0 * (jnp.sqrt(d2) - 0.55)),
                    0.0)

    # Layer 1: relu(fc(cat([goal, (x,y,col) per agent]))).
    # x1 = [goal | relx | rely | 1]; bias folded into the last row of w1a.
    h = jnp.dot(x1_ref[...], w1a_ref[...], preferred_element_type=jnp.float32)
    h = h + jnp.dot(col, w1c_ref[...], preferred_element_type=jnp.float32)
    h = jnp.maximum(h, 0.0)                           # dropout_fc == identity (eval)

    # Layer 2: relu(fc2(cat([h, r_pose, hist]))).
    # aux2 = [r_pose | hist | 1]; bias folded into the last row of w2aux.
    h2 = jnp.dot(h, w2h_ref[...], preferred_element_type=jnp.float32)
    h2 = h2 + jnp.dot(aux2_ref[...], w2aux_ref[...], preferred_element_type=jnp.float32)
    out_ref[...] = jnp.maximum(h2, 0.0)               # dropout_fc2 == identity (eval)


# ------------------------------------------------------------------------
# Wrapper: activation packing, weight regrouping, batch-tiled pallas_call
# ------------------------------------------------------------------------
def custom_encoder_forward(rel_vecs, goal_robot_rel, r_pose, padded_hist,
                           w_fc, b_fc, w_fc2, b_fc2, feature_size,
                           block_b=2048):
    """rel_vecs: (B, A, 2); weights stored as (in, out)."""
    B, A, _ = rel_vecs.shape
    F = feature_size
    OUT_PAD = 128                                  # lane-dense output width

    relx = rel_vecs[:, :, 0].astype(jnp.float32)
    rely = rel_vecs[:, :, 1].astype(jnp.float32)
    ones = jnp.ones((B, 1), jnp.float32)

    # --- packed activations ---------------------------------------------
    x1 = jnp.concatenate([goal_robot_rel, relx, rely, ones], axis=-1)   # (B, 2+2A+1)
    relxy = jnp.stack([relx, rely], axis=0)                             # (2, B, A)
    aux2 = jnp.concatenate([r_pose, padded_hist, ones], axis=-1)        # (B, 5+16(A+1)+1)

    # --- weight prep (hoist/cache in a real deployment) -------------------
    # fc input order is [goal(2), (x,y,col) interleaved per agent]; regroup the
    # rows to match x1's [goal | x.. | y..] layout and append the bias row.
    w1a = jnp.concatenate([w_fc[0:2], w_fc[2::3], w_fc[3::3],
                           b_fc.reshape(1, F)], axis=0)                 # (2+2A+1, F)
    w1c = w_fc[4::3]                                                    # (A, F) col rows
    pad_n = OUT_PAD - F
    w2h = jnp.pad(w_fc2[:F], ((0, 0), (0, pad_n)))                      # (F, 128)
    w2aux = jnp.pad(jnp.concatenate([w_fc2[F:], b_fc2.reshape(1, F)], axis=0),
                    ((0, 0), (0, pad_n)))                               # (5+16(A+1)+1, 128)

    # --- batch tiling ------------------------------------------------------
    # block_b=2048 keeps the double-buffered activation footprint a few MiB,
    # comfortably inside v5e's 16 MiB default scoped VMEM and v7x's 64 MiB.
    tb = block_b if B >= block_b else _round_up(B, 8)
    Bp = _round_up(B, tb)
    pad = Bp - B
    x1 = jnp.pad(x1, ((0, pad), (0, 0)))
    relxy = jnp.pad(relxy, ((0, 0), (0, pad), (0, 0)))
    aux2 = jnp.pad(aux2, ((0, pad), (0, 0)))

    k1 = x1.shape[1]
    kaux = aux2.shape[1]

    out = pl.pallas_call(
        encoder_kernel,
        out_shape=jax.ShapeDtypeStruct((Bp, OUT_PAD), jnp.float32),
        grid=(Bp // tb,),
        in_specs=[
            pl.BlockSpec((tb, k1), lambda i: (i, 0)),         # x1      (batch-tiled)
            pl.BlockSpec((2, tb, A), lambda i: (0, i, 0)),    # relxy   (batch-tiled)
            pl.BlockSpec((tb, kaux), lambda i: (i, 0)),       # aux2    (batch-tiled)
            pl.BlockSpec((k1, F), lambda i: (0, 0)),          # w1a     (VMEM-resident)
            pl.BlockSpec((A, F), lambda i: (0, 0)),           # w1c     (VMEM-resident)
            pl.BlockSpec((F, OUT_PAD), lambda i: (0, 0)),     # w2h     (VMEM-resident)
            pl.BlockSpec((kaux, OUT_PAD), lambda i: (0, 0)),  # w2aux   (VMEM-resident)
        ],
        out_specs=pl.BlockSpec((tb, OUT_PAD), lambda i: (i, 0)),
        compiler_params=pltpu.CompilerParams(
            dimension_semantics=("parallel",)),
    )(x1, relxy, aux2, w1a, w1c, w2h, w2aux)

    return out[:B, :F]


# ------------------------------------------------------------------------
# Pure-JAX reference (mirrors the PyTorch forward, eval-mode dropout)
# ------------------------------------------------------------------------
def reference_forward(rel_vecs, goal_robot_rel, r_pose, padded_hist,
                      w_fc, b_fc, w_fc2, b_fc2):
    dist = jnp.sqrt(rel_vecs[:, :, 0] ** 2 + rel_vecs[:, :, 1] ** 2)
    col = jnp.where(dist != 0.0, 1.0 - jax.nn.sigmoid((dist - 0.55) * 10.0), 0.0)
    sorted_rel = jnp.concatenate([rel_vecs, col[..., None]], axis=2)
    B, A, _ = sorted_rel.shape
    fc_in = jnp.concatenate([goal_robot_rel, sorted_rel.reshape(B, A * 3)], axis=-1)
    h = jax.nn.relu(fc_in @ w_fc + b_fc)
    fc2_in = jnp.concatenate([h, r_pose, padded_hist], axis=-1)
    return jax.nn.relu(fc2_in @ w_fc2 + b_fc2)


# ------------------------------------------------------------------------
# Main
# ------------------------------------------------------------------------
if __name__ == "__main__":
    key = jax.random.PRNGKey(0)

    # Small, forward-consistent shapes.
    B = 2                 # batch (x.shape[0])
    NUM_AGENT = 4
    FEATURE_SIZE = 32
    OBS_LEN = 8
    HIST = 8
    N_ACTIVE = B * (NUM_AGENT + 1)   # all agents present in every sequence

    k_x, k_pos, k_rel, k_goal, k_pose, k_wfc, k_bfc, k_wfc2, k_bfc2, k_whe = \
        jax.random.split(key, 10)
    x = jax.random.normal(k_x, (B, 64), dtype=jnp.float32)

    # TODO(synk): `prepare_states` is not provided; synthesize its outputs
    # deterministically with the shapes the forward implies.
    obs_traj_pos = jax.random.normal(k_pos, (OBS_LEN, N_ACTIVE, 2), dtype=jnp.float32)
    traj_rel = jax.random.normal(k_rel, (OBS_LEN, N_ACTIVE, 2), dtype=jnp.float32)
    robot_idx = jnp.arange(B) * (NUM_AGENT + 1)          # robot is slot 0 of each seq
    r_goal = jax.random.normal(k_goal, (B, 2), dtype=jnp.float32)
    r_pose = jax.random.normal(k_pose, (B, 5), dtype=jnp.float32)
    inx_agents_in_seq = jnp.arange(N_ACTIVE)             # every slot occupied

    # padded_cur_agents_obs -> drop robot slot -> relative vectors (B, A, 2)
    padded_cur = jnp.zeros((N_ACTIVE, 2), jnp.float32).at[inx_agents_in_seq].set(
        obs_traj_pos[-1])
    padded_cur = padded_cur.reshape(B, NUM_AGENT + 1, 2)[:, 1:]      # (B, A, 2)

    goal_robot_rel = r_goal - obs_traj_pos[-1, robot_idx]            # (B, 2)

    # TODO(synk): `Hist_Encoder` definition is not provided; stand-in = tanh
    # linear encoder of the last timestep of cat([traj_rel[:obs_len], obs_traj_pos]).
    hist_to_encode = jnp.concatenate([traj_rel[:OBS_LEN], obs_traj_pos], axis=-1)  # (8, N, 4)
    w_he = jax.random.uniform(k_whe, (4, 16), jnp.float32, -0.5, 0.5)
    enc_hist = jnp.tanh(hist_to_encode[-1] @ w_he)                   # (N_ACTIVE, 16)
    padded_hist = jnp.zeros((N_ACTIVE, 16), jnp.float32).at[inx_agents_in_seq].set(enc_hist)
    padded_hist = padded_hist.reshape(B, (NUM_AGENT + 1) * 16)       # (B, 80)

    # Deterministic parameters (PyTorch Linear-style uniform init, (in, out) layout).
    fc_in_dim = 2 + NUM_AGENT * 3
    fc2_in_dim = FEATURE_SIZE + 5 + (NUM_AGENT + 1) * 16
    lim1 = 1.0 / jnp.sqrt(fc_in_dim)
    lim2 = 1.0 / jnp.sqrt(fc2_in_dim)
    w_fc = jax.random.uniform(k_wfc, (fc_in_dim, FEATURE_SIZE), jnp.float32, -lim1, lim1)
    b_fc = jax.random.uniform(k_bfc, (FEATURE_SIZE,), jnp.float32, -lim1, lim1)
    w_fc2 = jax.random.uniform(k_wfc2, (fc2_in_dim, FEATURE_SIZE), jnp.float32, -lim2, lim2)
    b_fc2 = jax.random.uniform(k_bfc2, (FEATURE_SIZE,), jnp.float32, -lim2, lim2)

    # Run the Pallas kernel.
    out = custom_encoder_forward(padded_cur, goal_robot_rel, r_pose, padded_hist,
                                 w_fc, b_fc, w_fc2, b_fc2, FEATURE_SIZE)
    out = jax.block_until_ready(out)

    # Check against the pure-JAX reference of the original math.
    ref = reference_forward(padded_cur, goal_robot_rel, r_pose, padded_hist,
                            w_fc, b_fc, w_fc2, b_fc2)
    assert out.shape == (B, FEATURE_SIZE)
    assert jnp.allclose(out, ref, atol=2e-5, rtol=2e-5)

    print("KERNEL_OK")
</pallas_src>

<mosaic_0001>
module attributes {stable_mosaic.version = 11 : i64} {
  func.func @encoder_kernel(%arg0: i32, %arg1: memref<8x11xf32, #tpu.memory_space<vmem>>, %arg2: memref<2x8x4xf32, #tpu.memory_space<vmem>>, %arg3: memref<8x86xf32, #tpu.memory_space<vmem>>, %arg4: memref<11x32xf32, #tpu.memory_space<vmem>>, %arg5: memref<4x32xf32, #tpu.memory_space<vmem>>, %arg6: memref<32x128xf32, #tpu.memory_space<vmem>>, %arg7: memref<86x128xf32, #tpu.memory_space<vmem>>, %arg8: memref<8x128xf32, #tpu.memory_space<vmem>>) attributes {dimension_semantics = [#tpu.dimension_semantics<parallel>], iteration_bounds = array<i64: 1>, scalar_prefetch = 0 : i64, scratch_operands = 0 : i64, tpu.core_type = #tpu.core_type<tc>, window_params = [{transform_indices = @transform_0, window_bounds = array<i64: 8, 11>}, {transform_indices = @transform_1, window_bounds = array<i64: 2, 8, 4>}, {transform_indices = @transform_2, window_bounds = array<i64: 8, 86>}, {pipeline_mode = #tpu.pipeline_mode<synchronous>, transform_indices = @transform_3, window_bounds = array<i64: 11, 32>}, {pipeline_mode = #tpu.pipeline_mode<synchronous>, transform_indices = @transform_4, window_bounds = array<i64: 4, 32>}, {pipeline_mode = #tpu.pipeline_mode<synchronous>, transform_indices = @transform_5, window_bounds = array<i64: 32, 128>}, {pipeline_mode = #tpu.pipeline_mode<synchronous>, transform_indices = @transform_6, window_bounds = array<i64: 86, 128>}, {transform_indices = @transform_7, window_bounds = array<i64: 8, 128>}]} {
    %c0 = arith.constant 0 : index
    %c0_0 = arith.constant 0 : index
    %c0_1 = arith.constant 0 : index
    %0 = vector.load %arg2[%c0, %c0_0, %c0_1] : memref<2x8x4xf32, #tpu.memory_space<vmem>>, vector<1x8x4xf32>
    %1 = vector.shape_cast %0 : vector<1x8x4xf32> to vector<8x4xf32>
    %c1 = arith.constant 1 : index
    %c0_2 = arith.constant 0 : index
    %c0_3 = arith.constant 0 : index
    %2 = vector.load %arg2[%c1, %c0_2, %c0_3] : memref<2x8x4xf32, #tpu.memory_space<vmem>>, vector<1x8x4xf32>
    %3 = vector.shape_cast %2 : vector<1x8x4xf32> to vector<8x4xf32>
    %4 = arith.mulf %1, %1 : vector<8x4xf32>
    %5 = arith.mulf %3, %3 : vector<8x4xf32>
    %6 = arith.addf %4, %5 : vector<8x4xf32>
    %cst = arith.constant 0.000000e+00 : f32
    %7 = vector.broadcast %cst : f32 to vector<8x4xf32>
    %8 = arith.cmpf one, %6, %7 : vector<8x4xf32>
    %9 = math.sqrt %6 : vector<8x4xf32>
    %cst_4 = arith.constant 5.500000e-01 : f32
    %10 = vector.broadcast %cst_4 : f32 to vector<8x4xf32>
    %11 = arith.subf %9, %10 : vector<8x4xf32>
    %cst_5 = arith.constant -1.000000e+01 : f32
    %12 = vector.broadcast %cst_5 : f32 to vector<8x4xf32>
    %13 = arith.mulf %12, %11 : vector<8x4xf32>
    %14 = arith.negf %13 : vector<8x4xf32>
    %15 = math.exp %14 : vector<8x4xf32>
    %cst_6 = arith.constant 1.000000e+00 : f32
    %16 = vector.broadcast %cst_6 : f32 to vector<8x4xf32>
    %17 = arith.addf %16, %15 : vector<8x4xf32>
    %18 = arith.divf %16, %17 : vector<8x4xf32>
    %cst_7 = arith.constant 0.000000e+00 : f32
    %19 = vector.broadcast %cst_7 : f32 to vector<8x4xf32>
    %20 = arith.select %8, %18, %19 : vector<8x4xi1>, vector<8x4xf32>
    %c0_8 = arith.constant 0 : index
    %c0_9 = arith.constant 0 : index
    %21 = vector.load %arg1[%c0_8, %c0_9] : memref<8x11xf32, #tpu.memory_space<vmem>>, vector<8x11xf32>
    %c0_10 = arith.constant 0 : index
    %c0_11 = arith.constant 0 : index
    %22 = vector.load %arg4[%c0_10, %c0_11] : memref<11x32xf32, #tpu.memory_space<vmem>>, vector<11x32xf32>
    %cst_12 = arith.constant dense<0.000000e+00> : vector<8x32xf32>
    %23 = tpu.matmul %21, %22, %cst_12 {dimension_numbers = #tpu.dot_dimension_numbers<[1], [0], [0], [1], [0, 0, 1, 1], [], []>} : vector<8x11xf32>, vector<11x32xf32>, vector<8x32xf32> -> vector<8x32xf32>
    %c0_13 = arith.constant 0 : index
    %c0_14 = arith.constant 0 : index
    %24 = vector.load %arg5[%c0_13, %c0_14] : memref<4x32xf32, #tpu.memory_space<vmem>>, vector<4x32xf32>
    %cst_15 = arith.constant dense<0.000000e+00> : vector<8x32xf32>
    %25 = tpu.matmul %20, %24, %cst_15 {dimension_numbers = #tpu.dot_dimension_numbers<[1], [0], [0], [1], [0, 0, 1, 1], [], []>} : vector<8x4xf32>, vector<4x32xf32>, vector<8x32xf32> -> vector<8x32xf32>
    %26 = arith.addf %23, %25 : vector<8x32xf32>
    %cst_16 = arith.constant 0.000000e+00 : f32
    %27 = vector.broadcast %cst_16 : f32 to vector<8x32xf32>
    %28 = arith.maximumf %26, %27 : vector<8x32xf32>
    %c0_17 = arith.constant 0 : index
    %c0_18 = arith.constant 0 : index
    %29 = vector.load %arg6[%c0_17, %c0_18] : memref<32x128xf32, #tpu.memory_space<vmem>>, vector<32x128xf32>
    %cst_19 = arith.constant dense<0.000000e+00> : vector<8x128xf32>
    %30 = tpu.matmul %28, %29, %cst_19 {dimension_numbers = #tpu.dot_dimension_numbers<[1], [0], [0], [1], [0, 0, 1, 1], [], []>} : vector<8x32xf32>, vector<32x128xf32>, vector<8x128xf32> -> vector<8x128xf32>
    %c0_20 = arith.constant 0 : index
    %c0_21 = arith.constant 0 : index
    %31 = vector.load %arg3[%c0_20, %c0_21] : memref<8x86xf32, #tpu.memory_space<vmem>>, vector<8x86xf32>
    %c0_22 = arith.constant 0 : index
    %c0_23 = arith.constant 0 : index
    %32 = vector.load %arg7[%c0_22, %c0_23] : memref<86x128xf32, #tpu.memory_space<vmem>>, vector<86x128xf32>
    %cst_24 = arith.constant dense<0.000000e+00> : vector<8x128xf32>
    %33 = tpu.matmul %31, %32, %cst_24 {dimension_numbers = #tpu.dot_dimension_numbers<[1], [0], [0], [1], [0, 0, 1, 1], [], []>} : vector<8x86xf32>, vector<86x128xf32>, vector<8x128xf32> -> vector<8x128xf32>
    %34 = arith.addf %30, %33 : vector<8x128xf32>
    %cst_25 = arith.constant 0.000000e+00 : f32
    %35 = vector.broadcast %cst_25 : f32 to vector<8x128xf32>
    %36 = arith.maximumf %34, %35 : vector<8x128xf32>
    %c0_26 = arith.constant 0 : index
    %c0_27 = arith.constant 0 : index
    %37 = vector.load %arg8[%c0_26, %c0_27] : memref<8x128xf32, #tpu.memory_space<vmem>>, vector<8x128xf32>
    tpu.vector_store %arg8[%c0_26, %c0_27], %36 {strides = array<i32>} : memref<8x128xf32, #tpu.memory_space<vmem>>, vector<8x128xf32>,
    return
  }
  func.func @transform_0(%arg0: i32) -> (i32, i32) {
    %c0_i32 = arith.constant 0 : i32
    %c0_i32_0 = arith.constant 0 : i32
    return %arg0, %c0_i32 : i32, i32
  }
  func.func @transform_1(%arg0: i32) -> (i32, i32, i32) {
    %c0_i32 = arith.constant 0 : i32
    %c0_i32_0 = arith.constant 0 : i32
    %c0_i32_1 = arith.constant 0 : i32
    return %c0_i32, %arg0, %c0_i32_0 : i32, i32, i32
  }
  func.func @transform_2(%arg0: i32) -> (i32, i32) {
    %c0_i32 = arith.constant 0 : i32
    %c0_i32_0 = arith.constant 0 : i32
    return %arg0, %c0_i32 : i32, i32
  }
  func.func @transform_3(%arg0: i32) -> (i32, i32) {
    %c0_i32 = arith.constant 0 : i32
    %c0_i32_0 = arith.constant 0 : i32
    %c0_i32_1 = arith.constant 0 : i32
    return %c0_i32, %c0_i32_0 : i32, i32
  }
  func.func @transform_4(%arg0: i32) -> (i32, i32) {
    %c0_i32 = arith.constant 0 : i32
    %c0_i32_0 = arith.constant 0 : i32
    %c0_i32_1 = arith.constant 0 : i32
    return %c0_i32, %c0_i32_0 : i32, i32
  }
  func.func @transform_5(%arg0: i32) -> (i32, i32) {
    %c0_i32 = arith.constant 0 : i32
    %c0_i32_0 = arith.constant 0 : i32
    %c0_i32_1 = arith.constant 0 : i32
    return %c0_i32, %c0_i32_0 : i32, i32
  }
  func.func @transform_6(%arg0: i32) -> (i32, i32) {
    %c0_i32 = arith.constant 0 : i32
    %c0_i32_0 = arith.constant 0 : i32
    %c0_i32_1 = arith.constant 0 : i32
    return %c0_i32, %c0_i32_0 : i32, i32
  }
  func.func @transform_7(%arg0: i32) -> (i32, i32) {
    %c0_i32 = arith.constant 0 : i32
    %c0_i32_0 = arith.constant 0 : i32
    return %arg0, %c0_i32 : i32, i32
  }
}

</mosaic_0001>

<bundles_post_ra>
// kernel: tpu_custom_call.1
= control target key start
LH: loop header
LB: loop body
LE: loop exit
PB: predicated region body
PF: predicated region fallthrough
CT: control target
= control target key end

     0   :  { %12 = vsyncpa [#allocation3], 0  ;;  %s505_s0 = inlined_call_operand.vmem [shape: f32[8,11], index: 0, kind: input, shape index: {}]   ;;  %s506_s1 = inlined_call_operand.vmem [shape: f32[2,8,4], index: 1, kind: input, shape index: {}]   ;;  %s507_s2 = inlined_call_operand.hbm [shape: f32[8,86], index: 2, kind: input, shape index: {}]   ;;  %s508_s3 = inlined_call_operand.vmem [shape: f32[11,32], index: 3, kind: input, shape index: {}]   ;;  %s509_s4 = inlined_call_operand.hbm [shape: f32[4,32], index: 4, kind: input, shape index: {}]   ;;  %s510_s5 = inlined_call_operand.hbm [shape: f32[32,128], index: 5, kind: input, shape index: {}]   ;;  %s511_s6 = inlined_call_operand.hbm [shape: f32[86,128], index: 6, kind: input, shape index: {}]   ;;  %s512_s7 = inlined_call_operand.hbm [shape: f32[8,128], index: 7, kind: output, shape index: {}]  }
   0x1   :  { %13 = vsyncpa [#allocation6], 0 }
   0x2   :  { %14 = vsyncpa [#allocation9], 0  ;;  %s38_s26 = sshll.u32 %s509_s4, 4  ;;  %s39_s26 = int_to_ptr.hbm [resolvable:$true] %s38_s26 }
   0x3   :  { %15 = vsyncpa [#allocation4], 0  ;;  %s428_s27 = smov [#allocation5]   ;;  %s25_s8 = sshll.u32 %s507_s2, 4  ;;  %s26_s8 = int_to_ptr.hbm [resolvable:$true] %s25_s8 }
   0x4   :  { %s40_s28 = sshll.u32 %s428_s27, 4  ;;  %s429_s9 = smov [#allocation2]   ;;  %s41_s28 = int_to_ptr.vmem [resolvable:$true] %s40_s28 }
   0x5   :  { %43 = dma.hbm_to_vmem [thread:$0]  %s39_s26, 64, %s41_s28, [#allocation6]  }
   0x6   :  { %s27_s10 = sshll.u32 %s429_s9, 4  ;;  %s48_s13 = sshll.u32 %s510_s5, 4  ;;  %s28_s10 = int_to_ptr.vmem [resolvable:$true] %s27_s10  ;;  %s49_s13 = int_to_ptr.hbm [resolvable:$true] %s48_s13 }
   0x7   :  { %30 = dma.hbm_to_vmem [thread:$0]  %s26_s8, 128, %s28_s10, [#allocation3]  }
   0x8   :  { %s430_s4 = smov [#allocation7]   ;;  %s61_s17 = sshll.u32 %s511_s6, 4  ;;  %s62_s17 = int_to_ptr.hbm [resolvable:$true] %s61_s17 }
   0x9   :  { %s50_s14 = sshll.u32 %s430_s4, 4  ;;  %s431_s18 = smov 128   ;;  %s51_s14 = int_to_ptr.vmem [resolvable:$true] %s50_s14 }
   0xa   :  { %s432_s2 = smov 8   ;;  %s433_s19 = smov [#allocation8]  }
   0xb   :  { %56 = dma.hbm_to_vmem [thread:$0]  %s49_s13, 512, %s51_s14, [#allocation6], %s431_s18, %s431_s18, %s432_s2  }
   0xc   :  { %s63_s20 = sshll.u32 %s433_s19, 4  ;;  %s64_s20 = int_to_ptr.vmem [resolvable:$true] %s63_s20 }
   0xd   :  { %69 = dma.hbm_to_vmem [thread:$0]  %s62_s17, 1408, %s64_s20, [#allocation9], %s431_s18, %s431_s18, %s432_s2  }
   0xe   :  { %420 = dma.done.wait [#allocation3], 128  }
   0xf   :  { %421 = vsyncadd [#allocation3], 4294967168 }
  0x10   :  { %422 = dma.done.wait [#allocation6], 576  }
  0x11   :  { %423 = vsyncadd [#allocation6], 4294966720 }
  0x12   :  { %424 = dma.done.wait [#allocation9], 1408  }
  0x13   :  { %425 = vsyncadd [#allocation9], 4294965888  ;;  %vm163_vm0 = vcmask 1042432   ;;  %vm135_vm1 = vcmask 1043456   ;;  %v129_v0 = vld [vmem:[%s508_s3 + $0x8] sm:$0x7] }
  0x14   :  { %v130_v1 = vld [vmem:[#allocation5] sm:$0xf]  ;;  %v128_v2 = vld [vmem:[%s508_s3] sm:$0xff]  ;;  %282 = vmatpush.msk.msra.mxu1 %vm163_vm0, %v129_v0  ;;  %vm159_vm4 = vcmask 89088   ;;  %vm208_vm5 = vcmask 1045504   ;;  %v202_v21 = vld [vmem:[#allocation8 + $0x48] sm:$0xff] }
  0x15   :  { %280 = vmatpush.msk.msra.mxu0 %vm135_vm1, %v130_v1  ;;  %v86_v3 = vld [vmem:[%s506_s1] sm:$0xff]  ;;  %v277_v4 = vld [vmem:[%s506_s1 + $0x8] sm:$0xff]  ;;  %v198_v28 = vld [vmem:[#allocation8 + $0x28] sm:$0xff]  ;;  %vm131_vm11 = vcmask 31744   ;;  %vm204_vm12 = vcmask 703488   ;;  %vm232_vm13 = vcmask 261120  }
  0x16   :  { %v89_v5 = vmul.f32 %v86_v3, %v86_v3  ;;  %v90_v6 = vmul.f32 %v277_v4, %v277_v4  ;;  %182 = vmatpush.msra.mxu1 %v128_v2  ;;  %v127_v19 = vld [vmem:[%s505_s0] sm:$0xff]  ;;  %v201_v23 = vld [vmem:[#allocation8 + $0x40] sm:$0xff]  ;;  %v194_v46 = vld [vmem:[#allocation8 + $0x8] sm:$0xff]  ;;  %s434_s0 = smov [#allocation10]   ;;  %s265_s30 = sshll.u32 %s512_s7, 4  ;;  %s266_s30 = int_to_ptr.hbm [resolvable:$true] %s265_s30 }
  0x17   :  { %283 = vmatmul.msk.f32.vlgmr.msra.gmra.mxu1 %vm159_vm4, %v127_v19  ;;  %v203_v20 = vld [vmem:[#allocation8 + $0x50] sm:$0x3f]  ;;  %v191_v24 = vld [vmem:[#allocation7 + $0x18] sm:$0xff]  ;;  %v197_v29 = vld [vmem:[#allocation8 + $0x20] sm:$0xff]  ;;  %s263_s27 = sshll.u32 %s434_s0, 4  ;;  %s264_s27 = int_to_ptr.vmem [resolvable:$true] %s263_s27 }
  0x18   :  { %v91_v7 = vadd.f32 %v90_v6, %v89_v5  ;;  %284 = vmatpush.msk.msra.mxu2 %vm208_vm5, %v203_v20  ;;  %248 = vmatpush.msra.mxu3 %v191_v24  ;;  %v200_v26 = vld [vmem:[#allocation8 + $0x38] sm:$0xff]  ;;  %v199_v27 = vld [vmem:[#allocation8 + $0x30] sm:$0xff]  ;;  %v189_v47 = vld [vmem:[#allocation7 + $0x8] sm:$0xff] }
  0x19   :  { %v196_v32 = vld [vmem:[#allocation8 + $0x18] sm:$0xff]  ;;  %v195_v44 = vld [vmem:[#allocation8 + $0x10] sm:$0xff]  ;;  %v193_v48 = vld [vmem:[#allocation8] sm:$0xff] }
  0x1a   :  { %294 = vrsqrt.f32 %v91_v7  ;;  %vm100_vm2 = vcmp.eq.f32.partialorder %v91_v7, inf  ;;  %v103_v14 = vand.u32 2147483648, %v91_v7  ;;  %vm102_vm3 = vcmp.eq.f32.partialorder %v91_v7, 0.0  ;;  %218 = vmatpush.msra.mxu2 %v202_v21  ;;  %v190_v45 = vld [vmem:[#allocation7 + $0x10] sm:$0xff]  ;;  %v188_v49 = vld [vmem:[#allocation7] sm:$0xff] }
  0x1b   :  { %vm92_vm10 = vcmp.ne.f32.partialorder %v91_v7, 0.0  ;;  %249 = vmatpush.msra.mxu3 %v190_v45  ;;  %v192_v50 = vld [vmem:[#allocation2] sm:$0xff] }
  0x1c   :  { %219 = vmatpush.msra.mxu2 %v201_v23 }
  0x1d   :  { %250 = vmatpush.msra.mxu3 %v189_v47 }
  0x1e   :  { %220 = vmatpush.msra.mxu2 %v200_v26 }
  0x1f   :  { %251 = vmatpush.msra.mxu3 %v188_v49 }
  0x20   :  { %v295_v8 = vpop.eup %294  ;;  %221 = vmatpush.msra.mxu2 %v199_v27 }
  0x21   :  { %v94_v9 = vmul.f32 %v295_v8, %v91_v7 }
  0x22   :  { %222 = vmatpush.msra.mxu2 %v198_v28 }
  0x23   :  { %v95_v10 = vmul.f32 %v295_v8, %v94_v9 }
  0x24   :  { %223 = vmatpush.msra.mxu2 %v197_v29 }
  0x25   :  { %v96_v11 = vmul.f32 0.5, %v95_v10 }
  0x26   :  { %224 = vmatpush.msra.mxu2 %v196_v32 }
  0x27   :  { %v97_v12 = vsub.f32 1.5, %v96_v11 }
  0x28   :  { %225 = vmatpush.msra.mxu2 %v195_v44 }
  0x29   :  { %v98_v13 = vmul.f32 %v295_v8, %v97_v12 }
  0x2a   :  { %226 = vmatpush.msra.mxu2 %v194_v46 }
  0x2b   :  { %v99_v15 = vmul.f32 %v98_v13, %v91_v7 }
  0x2c   :  { %227 = vmatpush.msra.mxu2 %v193_v48 }
  0x2d   :  { %v101_v16 = vsel %vm100_vm2, %v91_v7, %v99_v15  ;;  %285 = vmatmul.msk.f32.vlgmr.msra.gmra.mxu2 %vm204_vm12, %v192_v50 }
  0x2e   :  { %v104_v17 = vsel %vm102_vm3, %v103_v14, %v101_v16 }
  0x2f   :  { %v278_v18 = vadd.f32 -0.55, %v104_v17 }
  0x31   :  { %v279_v22 = vmul.f32 10.0, %v278_v18 }
  0x33   :  { %v108_v25 = vmul.f32 1.442695, %v279_v22 }
  0x35   :  { %296 = vpow2.f32 %v108_v25 }
  0x3b   :  { %v297_v30 = vpop.eup %296 }
  0x3c   :  { %v110_v31 = vadd.f32 1.0, %v297_v30 }
  0x3e   :  { %298 = vrcp.f32 %v110_v31  ;;  %v122_v35 = vand.u32 2147483648, %v110_v31  ;;  %vm116_vm6 = vweird.f32 %v110_v31  ;;  %v120_v37 = vand.u32 2147483647, %v110_v31 }
  0x40   :  { %v123_v39 = vor.u32 1.1754944e-38, %v122_v35  ;;  %vm121_vm9 = vcmp.eq.f32.partialorder %v120_v37, 8.507059e+37 }
  0x44   :  { %v299_v33 = vpop.eup %298 }
  0x45   :  { %v112_v34 = vmul.f32 %v299_v33, %v110_v31  ;;  %vm117_vm7 = vweird.f32 %v299_v33 }
  0x46   :  { %vm118_vm8 = vmor %vm116_vm6, %vm117_vm7 }
  0x47   :  { %v113_v36 = vsub.f32 1.0, %v112_v34 }
  0x49   :  { %v114_v38 = vmul.f32 %v299_v33, %v113_v36 }
  0x4b   :  { %v115_v40 = vadd.f32 %v299_v33, %v114_v38 }
  0x4d   :  { %v119_v41 = vsel %vm118_vm8, %v299_v33, %v115_v40 }
  0x4e   :  { %v124_v42 = vsel %vm121_vm9, %v123_v39, %v119_v41 }
  0x4f   :  { %v126_v43 = vsel %vm92_vm10, %v124_v42, 0.0 }
  0x50   :  { %281 = vmatmul.msk.f32.vlgmr.msra.gmra.mxu0 %vm131_vm11, %v126_v43 }
  0x94   :  { %v184_v51 = vpop.f32.mrf.mxu1 }
  0xb0   :  { %v229_v55 = vpop.f32.mrf.mxu2 }
  0xcd   :  { %v156_v52 = vpop.f32.mrf.mxu0 }
  0xce   :  { %v185_v53 = vadd.f32 %v184_v51, %v156_v52 }
  0xd0   :  { %v187_v54 = vmax.f32 %v185_v53, 0.0 }
  0xd2   :  { %286 = vmatmul.msk.f32.vlgmr.msra.gmra.mxu3 %vm232_vm13, %v187_v54 }
 0x155   :  { %v253_v56 = vpop.f32.mrf.mxu3 }
 0x156   :  { %v254_v57 = vadd.f32 %v253_v56, %v229_v55 }
 0x158   :  { %v256_v58 = vmax.f32 %v254_v57, 0.0 }
 0x15a   :  { %257 = vst [vmem:[#allocation10] sm:$0xff] %v256_v58 }
 0x15b   :  { %268 = dma.vmem_to_hbm [thread:$0]  %s264_s27, 128, %s266_s30, [#allocation4]  }
 0x15c   :  { %426 = dma.done.wait [#allocation4], 128  }
 0x15d   :  { %427 = vsyncadd [#allocation4], 4294967168 }
 0x15e   :  { %273 = vsyncpa [#allocation3], 1 }
 0x15f   :  { %274 = vsyncpa [#allocation6], 1 }
 0x160   :  { %275 = vsyncpa [#allocation9], 1 }
 0x161   :  { %276 = vsyncpa [#allocation4], 1 }

</bundles_post_ra>
